<compile_context>
chip_gen: v6e
topology: v6e:2x2x1
jax: 0.10.0
libtpu: 0.0.40
codegen_flags: <defaults>
</compile_context>

<pallas_src>
import functools

import jax
import jax.numpy as jnp
from jax.experimental import pallas as pl
from jax.experimental.pallas import tpu as pltpu

SUBLANE = 8
LANE = 128
MAX_TILE_ROWS = 8192   # 4 MiB f32 per input block
NUM_CORES = 2          # leading "parallel" axis; serializes on 1-TC chips


def _rmse_partial_kernel(x_ref, y_ref, o_ref, *, tile_rows, valid_rows, kpc,
                         n_full_blocks, needs_mask):
    """Accumulate per-lane sums of (x - y)^2 into a resident (8,128) block."""
    p = pl.program_id(0)   # core (parallel) index
    k = pl.program_id(1)   # per-core block (reduction) index

    @pl.when(k == 0)
    def _():
        o_ref[...] = jnp.zeros_like(o_ref)

    d = x_ref[...].astype(jnp.float32) - y_ref[...].astype(jnp.float32)
    sq = d * d
    groups = tile_rows // SUBLANE

    if needs_mask:
        g = p * kpc + k  # logical (unclamped) global block index

        @pl.when(g < n_full_blocks)
        def _():  # fast path: fully valid block, no mask work
            o_ref[...] += sq.reshape(groups, SUBLANE, LANE).sum(axis=0)

        @pl.when(g >= n_full_blocks)
        def _():  # ragged last block or padded duplicate slot
            rows_left = valid_rows - g * tile_rows  # may be <= 0
            row_ids = jax.lax.broadcasted_iota(jnp.int32, sq.shape, 0)
            sqm = jnp.where(row_ids < rows_left, sq, 0.0)
            o_ref[...] += sqm.reshape(groups, SUBLANE, LANE).sum(axis=0)
    else:
        o_ref[...] += sq.reshape(groups, SUBLANE, LANE).sum(axis=0)


def rmse_loss(x, y, *, max_tile_rows: int = MAX_TILE_ROWS):
    assert x.shape == y.shape, "x and y must have the same shape"
    assert max_tile_rows >= SUBLANE and max_tile_rows % SUBLANE == 0
    n = x.size
    assert n > 0

    xf = x.reshape(-1)
    yf = y.reshape(-1)

    # 128-aligned prefix handled by the kernel; the short tail by jnp.
    bulk = (n // LANE) * LANE
    if bulk < SUBLANE * LANE:   # too small to be worth a kernel launch
        bulk = 0
    tail = n - bulk

    total = jnp.float32(0.0)

    if bulk > 0:
        rows = bulk // LANE                     # >= 8
        xb = xf if bulk == n else xf[:bulk]
        yb = yf if bulk == n else yf[:bulk]
        x2 = xb.reshape(rows, LANE)
        y2 = yb.reshape(rows, LANE)

        tile_rows = min(max_tile_rows, (rows // SUBLANE) * SUBLANE)
        nblocks = pl.cdiv(rows, tile_rows)
        n_full_blocks = rows // tile_rows
        ncores = NUM_CORES if nblocks >= NUM_CORES else 1
        kpc = pl.cdiv(nblocks, ncores)          # grid steps per core
        needs_mask = (ncores * kpc) != n_full_blocks

        def in_map(p, k):
            # Clamp padded trailing slots onto the last real block; their
            # contribution is masked to zero inside the kernel.
            return (jnp.minimum(p * kpc + k, nblocks - 1), 0)

        kernel = functools.partial(
            _rmse_partial_kernel,
            tile_rows=tile_rows,
            valid_rows=rows,
            kpc=kpc,
            n_full_blocks=n_full_blocks,
            needs_mask=needs_mask,
        )

        partials = pl.pallas_call(
            kernel,
            out_shape=jax.ShapeDtypeStruct((ncores * SUBLANE, LANE),
                                           jnp.float32),
            grid_spec=pltpu.PrefetchScalarGridSpec(
                num_scalar_prefetch=0,
                grid=(ncores, kpc),
                in_specs=[
                    pl.BlockSpec((tile_rows, LANE), in_map),
                    pl.BlockSpec((tile_rows, LANE), in_map),
                ],
                out_specs=pl.BlockSpec((SUBLANE, LANE), lambda p, k: (p, 0)),
            ),
            compiler_params=pltpu.CompilerParams(
                dimension_semantics=("parallel", "arbitrary"),
                vmem_limit_bytes=32 * 1024 * 1024,
            ),
            cost_estimate=pl.CostEstimate(
                flops=3 * bulk,
                transcendentals=0,
                bytes_accessed=2 * bulk * x.dtype.itemsize,
            ),
        )(x2, y2)

        total = total + jnp.sum(partials)

    if tail > 0:
        dt = xf[bulk:].astype(jnp.float32) - yf[bulk:].astype(jnp.float32)
        total = total + jnp.sum(dt * dt)

    # 0-dim scalar, matching torch's scalar loss tensor.
    return jnp.sqrt(total / jnp.float32(n))


if __name__ == "__main__":
    key = jax.random.PRNGKey(0)

    # Primary check: small NCHW shape implied by the module's typical use.
    kx, ky = jax.random.split(key)
    x = jax.random.normal(kx, (2, 4, 16, 16), dtype=jnp.float32)
    y = jax.random.normal(ky, (2, 4, 16, 16), dtype=jnp.float32)
    loss = jax.block_until_ready(rmse_loss(x, y))
    ref = jnp.sqrt(jnp.mean((x - y) ** 2))
    assert jnp.allclose(loss, ref, rtol=1e-5, atol=1e-6), (loss, ref)

    # Multi-block / two-core / padded-slot paths (small tiles to exercise).
    kx2, ky2 = jax.random.split(jax.random.PRNGKey(1))
    x2 = jax.random.normal(kx2, (8, 8, 64, 40), dtype=jnp.float32)
    y2 = jax.random.normal(ky2, (8, 8, 64, 40), dtype=jnp.float32)
    ref2 = jnp.sqrt(jnp.mean((x2 - y2) ** 2))
    loss2a = jax.block_until_ready(rmse_loss(x2, y2))                     # 1 block
    loss2b = jax.block_until_ready(rmse_loss(x2, y2, max_tile_rows=256))  # 2 cores
    assert jnp.allclose(loss2a, ref2, rtol=1e-5, atol=1e-6), (loss2a, ref2)
    assert jnp.allclose(loss2b, ref2, rtol=1e-5, atol=1e-6), (loss2b, ref2)

    # Ragged size: 128-aligned bulk + <128-element jnp tail + ragged block.
    kx3, ky3 = jax.random.split(jax.random.PRNGKey(2))
    x3 = jax.random.normal(kx3, (5, 7, 9, 13), dtype=jnp.float32)
    y3 = jax.random.normal(ky3, (5, 7, 9, 13), dtype=jnp.float32)
    loss3 = jax.block_until_ready(rmse_loss(x3, y3, max_tile_rows=16))
    ref3 = jnp.sqrt(jnp.mean((x3 - y3) ** 2))
    assert jnp.allclose(loss3, ref3, rtol=1e-5, atol=1e-6), (loss3, ref3)

    print("KERNEL_OK")
</pallas_src>

<mosaic_0001>
module attributes {stable_mosaic.version = 11 : i64} {
  func.func @_rmse_partial_kernel(%arg0: i32, %arg1: i32, %arg2: memref<16x128xf32, #tpu.memory_space<vmem>>, %arg3: memref<16x128xf32, #tpu.memory_space<vmem>>, %arg4: memref<8x128xf32, #tpu.memory_space<vmem>>) attributes {dimension_semantics = [#tpu.dimension_semantics<parallel>, #tpu.dimension_semantics<arbitrary>], iteration_bounds = array<i64: 1, 1>, scalar_prefetch = 0 : i64, scratch_operands = 0 : i64, tpu.core_type = #tpu.core_type<tc>, window_params = [{transform_indices = @transform_0, window_bounds = array<i64: 16, 128>}, {transform_indices = @transform_1, window_bounds = array<i64: 16, 128>}, {transform_indices = @transform_2, window_bounds = array<i64: 8, 128>}]} {
    %c0_i32 = arith.constant 0 : i32
    %0 = arith.cmpi eq, %arg1, %c0_i32 : i32
    %1 = arith.extui %0 : i1 to i32
    %c0_i32_0 = arith.constant 0 : i32
    %2 = arith.cmpi ne, %1, %c0_i32_0 : i32
    scf.if %2 {
      %cst_8 = arith.constant 0.000000e+00 : f32
      %12 = vector.broadcast %cst_8 : f32 to vector<8x128xf32>
      %c0_9 = arith.constant 0 : index
      %c0_10 = arith.constant 0 : index
      %13 = vector.load %arg4[%c0_9, %c0_10] : memref<8x128xf32, #tpu.memory_space<vmem>>, vector<8x128xf32>
      tpu.vector_store %arg4[%c0_9, %c0_10], %12 {strides = array<i32>} : memref<8x128xf32, #tpu.memory_space<vmem>>, vector<8x128xf32>,
    } else {
    }
    %c0 = arith.constant 0 : index
    %c0_1 = arith.constant 0 : index
    %3 = vector.load %arg2[%c0, %c0_1] : memref<16x128xf32, #tpu.memory_space<vmem>>, vector<16x128xf32>
    %c0_2 = arith.constant 0 : index
    %c0_3 = arith.constant 0 : index
    %4 = vector.load %arg3[%c0_2, %c0_3] : memref<16x128xf32, #tpu.memory_space<vmem>>, vector<16x128xf32>
    %5 = arith.subf %3, %4 : vector<16x128xf32>
    %6 = arith.mulf %5, %5 : vector<16x128xf32>
    %c0_4 = arith.constant 0 : index
    %c0_5 = arith.constant 0 : index
    %7 = vector.load %arg4[%c0_4, %c0_5] : memref<8x128xf32, #tpu.memory_space<vmem>>, vector<8x128xf32>
    %8 = vector.shape_cast %6 : vector<16x128xf32> to vector<2x8x128xf32>
    %cst = arith.constant dense<0.000000e+00> : vector<8x128xf32>
    %9 = vector.multi_reduction <add>, %8, %cst [0] : vector<2x8x128xf32> to vector<8x128xf32>
    %10 = arith.addf %7, %9 : vector<8x128xf32>
    %c0_6 = arith.constant 0 : index
    %c0_7 = arith.constant 0 : index
    %11 = vector.load %arg4[%c0_6, %c0_7] : memref<8x128xf32, #tpu.memory_space<vmem>>, vector<8x128xf32>
    tpu.vector_store %arg4[%c0_6, %c0_7], %10 {strides = array<i32>} : memref<8x128xf32, #tpu.memory_space<vmem>>, vector<8x128xf32>,
    return
  }
  func.func @transform_0(%arg0: i32, %arg1: i32) -> (i32, i32) {
    %c1_i32 = arith.constant 1 : i32
    %0 = arith.muli %arg0, %c1_i32 : i32
    %1 = arith.addi %0, %arg1 : i32
    %c0_i32 = arith.constant 0 : i32
    %2 = arith.minsi %1, %c0_i32 : i32
    %c0_i32_0 = arith.constant 0 : i32
    %c0_i32_1 = arith.constant 0 : i32
    return %2, %c0_i32_0 : i32, i32
  }
  func.func @transform_1(%arg0: i32, %arg1: i32) -> (i32, i32) {
    %c1_i32 = arith.constant 1 : i32
    %0 = arith.muli %arg0, %c1_i32 : i32
    %1 = arith.addi %0, %arg1 : i32
    %c0_i32 = arith.constant 0 : i32
    %2 = arith.minsi %1, %c0_i32 : i32
    %c0_i32_0 = arith.constant 0 : i32
    %c0_i32_1 = arith.constant 0 : i32
    return %2, %c0_i32_0 : i32, i32
  }
  func.func @transform_2(%arg0: i32, %arg1: i32) -> (i32, i32) {
    %c0_i32 = arith.constant 0 : i32
    %c0_i32_0 = arith.constant 0 : i32
    return %arg0, %c0_i32 : i32, i32
  }
}

</mosaic_0001>

<bundles_post_ra>
// kernel: tpu_custom_call.1
= control target key start
LH: loop header
LB: loop body
LE: loop exit
PB: predicated region body
PF: predicated region fallthrough
CT: control target
= control target key end

     0   :  { %7 = vsyncpa [#allocation3], 0  ;;  %s198_s0 = inlined_call_operand.hbm [shape: f32[16,128], index: 0, kind: input, shape index: {}]   ;;  %s199_s1 = inlined_call_operand.hbm [shape: f32[16,128], index: 1, kind: input, shape index: {}]   ;;  %s200_s2 = inlined_call_operand.hbm [shape: f32[8,128], index: 2, kind: output, shape index: {}]  }
   0x1   :  { %8 = vsyncpa [#allocation6], 0 }
   0x2   :  { %9 = vsyncpa [#allocation4], 0  ;;  %s169_s9 = smov [#allocation2]  }
   0x3   :  { %s21_s10 = sshll.u32 %s169_s9, 4  ;;  %s22_s10 = int_to_ptr.vmem [resolvable:$true] %s21_s10 }
   0x4   :  { %s111_s11 = scalar_lea.vmem %s22_s10, 256  ;;  %p116_p1 = scmp.lt.s32.totalorder %s22_s10, %s22_s10 }
   0x5   :  { %p112_p0 = scmp.ne.s32.totalorder %s22_s10, %s111_s11  ;;  %p117_p2 = scmp.lt.s32.totalorder %s111_s11, %s111_s11 }
   0x7   :  { %p118_p3 = por %p117_p2, %p116_p1 }
   0x9   :  { %p119_p4 = pnand %p118_p3, %p112_p0 }
   0xb   :  { %122 = shalt.err (!%p119_p4)
}
   0xc   :  { %s170_s12 = smov 128   ;;  %s171_s13 = smov 8  }
   0xd   :  { %27 = dma.hbm_to_vmem [thread:$0]  %s198_s0, 256, %s22_s10, [#allocation3], %s170_s12, %s170_s12, %s171_s13  }
   0xe   :  { %s172_s16 = smov [#allocation5]  }
   0xf   :  { %s39_s17 = sshll.u32 %s172_s16, 4  ;;  %s40_s17 = int_to_ptr.vmem [resolvable:$true] %s39_s17 }
  0x10   :  { %s131_s18 = scalar_lea.vmem %s40_s17, 256  ;;  %p136_p6 = scmp.lt.s32.totalorder %s40_s17, %s40_s17 }
  0x11   :  { %p132_p5 = scmp.ne.s32.totalorder %s40_s17, %s131_s18  ;;  %p137_p7 = scmp.lt.s32.totalorder %s131_s18, %s131_s18 }
  0x13   :  { %p138_p8 = por %p137_p7, %p136_p6 }
  0x15   :  { %p139_p9 = pnand %p138_p8, %p132_p5 }
  0x17   :  { %142 = shalt.err (!%p139_p9)
}
  0x18   :  { %45 = dma.hbm_to_vmem [thread:$0]  %s199_s1, 256, %s40_s17, [#allocation6], %s170_s12, %s170_s12, %s171_s13  }
  0x19   :  { %163 = dma.done.wait [#allocation3], 256  }
  0x1a   :  { %164 = vsyncadd [#allocation3], 4294967040 }
  0x1b   :  { %165 = dma.done.wait [#allocation6], 256  }
  0x1c   :  { %166 = vsyncadd [#allocation6], 4294967040  ;;  %v65_v0 = vld [vmem:[#allocation2] sm:$0xff]  ;;  %v66_v1 = vld [vmem:[#allocation2 + $0x8] sm:$0xff]  ;;  %s173_s0 = smov [#allocation7]  }
  0x1d   :  { %v67_v2 = vld [vmem:[#allocation5] sm:$0xff]  ;;  %v68_v3 = vld [vmem:[#allocation5 + $0x8] sm:$0xff]  ;;  %s83_s21 = sshll.u32 %s173_s0, 4  ;;  %s84_s21 = int_to_ptr.vmem [resolvable:$true] %s83_s21 }
  0x1e   :  { %v69_v4 = vsub.f32 %v65_v0, %v67_v2  ;;  %v70_v5 = vsub.f32 %v66_v1, %v68_v3  ;;  %s143_s22 = scalar_lea.vmem %s84_s21, 128  ;;  %p148_p11 = scmp.lt.s32.totalorder %s84_s21, %s84_s21 }
  0x1f   :  { %p144_p10 = scmp.ne.s32.totalorder %s84_s21, %s143_s22  ;;  %p149_p12 = scmp.lt.s32.totalorder %s143_s22, %s143_s22 }
  0x20   :  { %v71_v6 = vmul.f32 %v69_v4, %v69_v4  ;;  %v72_v7 = vmul.f32 %v70_v5, %v70_v5 }
  0x21   :  { %p150_p13 = por %p149_p12, %p148_p11 }
  0x22   :  { %v74_v8 = vadd.f32 %v72_v7, %v71_v6 }
  0x23   :  { %p151_p0 = pnand %p150_p13, %p144_p10 }
  0x24   :  { %76 = vst [vmem:[#allocation7] sm:$0xff] %v74_v8 }
  0x25   :  { %154 = shalt.err (!%p151_p0)
}
  0x26   :  { %86 = dma.vmem_to_hbm [thread:$0]  %s84_s21, 128, %s200_s2, [#allocation4]  }
  0x27   :  { %167 = dma.done.wait [#allocation4], 128  }
  0x28   :  { %168 = vsyncadd [#allocation4], 4294967168 }
  0x29   :  { %90 = vsyncpa [#allocation3], 1 }
  0x2a   :  { %91 = vsyncpa [#allocation6], 1 }
  0x2b   :  { %92 = vsyncpa [#allocation4], 1 }

</bundles_post_ra>
